<compile_context>
chip_gen: v7x
topology: tpu7x:2x2x1
jax: 0.10.0
libtpu: 0.0.40
codegen_flags: <defaults>
</compile_context>

<pallas_src>
import functools
import math

import jax
import jax.numpy as jnp
from jax import lax
from jax.experimental import pallas as pl
from jax.experimental.pallas import tpu as pltpu


NEG_BIG = -1e30  # large finite negative (avoids -inf - -inf NaN paths)


def head_kernel(xq_ref, xkv_ref, wq_ref, wkv_ref, o_ref,
                q_sc, m_sc, l_sc, acc_sc, *, scale, hp):
    """Grid = (B, n_q_tiles, n_kv_tiles); kv is the (arbitrary) reduction axis.

    xq_ref  : (1, tq, C)   bf16  query-row tile of x
    xkv_ref : (1, tk, C)   bf16  key/value-row tile of x
    wq_ref  : (C, HP)      bf16  padded query weight
    wkv_ref : (C, 2*HP)    bf16  fused padded [Wk | Wv]
    o_ref   : (1, tq, HP)  f32   lane-dense padded output
    """
    qi = pl.program_id(1)
    kvi = pl.program_id(2)

    @pl.when(kvi == 0)
    def _init():
        # Query projection, computed once per q tile; scale folded in here
        # (tq*HP multiplies instead of tq*tk on the score matrix).
        q = jnp.dot(xq_ref[0], wq_ref[...], preferred_element_type=jnp.float32)
        q_sc[...] = (q * scale).astype(q_sc.dtype)
        m_sc[...] = jnp.full_like(m_sc, NEG_BIG)
        l_sc[...] = jnp.zeros_like(l_sc)
        acc_sc[...] = jnp.zeros_like(acc_sc)

    # Causal skip: KV tiles strictly above the diagonal contribute nothing.
    @pl.when(kvi <= qi)
    def _compute():
        # Fused K|V projection for this KV tile: a single (tk,C)x(C,2*HP) dot.
        kv = jnp.dot(xkv_ref[0], wkv_ref[...],
                     preferred_element_type=jnp.float32)
        k = kv[:, :hp].astype(jnp.bfloat16)
        v = kv[:, hp:].astype(jnp.bfloat16)

        # Scores: contract last dims directly (no materialized transpose).
        s = lax.dot_general(q_sc[...], k, (((1,), (1,)), ((), ())),
                            preferred_element_type=jnp.float32)   # (tq, tk)

        # Causal mask: only the diagonal tile is partially masked (tq == tk);
        # strictly-below-diagonal tiles pass through untouched.
        tq, tk = s.shape
        row = lax.broadcasted_iota(jnp.int32, (tq, tk), 0)
        col = lax.broadcasted_iota(jnp.int32, (tq, tk), 1)
        s = jnp.where((col <= row) | (kvi < qi), s, NEG_BIG)

        # Online softmax update (f32 statistics, bf16 MXU operands).
        m_prev = m_sc[...]
        m_new = jnp.maximum(m_prev, jnp.max(s, axis=-1, keepdims=True))
        alpha = jnp.exp(m_prev - m_new)
        p = jnp.exp(s - m_new)
        l_sc[...] = alpha * l_sc[...] + jnp.sum(p, axis=-1, keepdims=True)
        acc_sc[...] = alpha * acc_sc[...] + jnp.dot(
            p.astype(jnp.bfloat16), v, preferred_element_type=jnp.float32)
        m_sc[...] = m_new

    # The diagonal tile is the last one contributing to this q tile; the
    # output block stays resident (same block index) for later kv steps.
    @pl.when(kvi == qi)
    def _finalize():
        inv = pl.reciprocal(l_sc[...], approx=True)
        o_ref[0] = (acc_sc[...] * inv).astype(o_ref.dtype)


def head_forward(x, wk, wq, wv):
    """x: (B, T, C) f32; wk/wq/wv: (C, head_size) f32 -> (B, T, head_size) f32."""
    B, T, C = x.shape
    H = wk.shape[1]
    HP = max(128, ((H + 127) // 128) * 128)   # lane-dense padded head size
    scale = C ** (-0.5)                       # embedding dim, per the module

    # Flash tile sizes; tq == tk keeps the causal tile logic simple.
    if T % 128 == 0:
        tq = tk = 128
    else:
        tq = tk = T
    nq, nk = T // tq, T // tk

    # bf16 MXU operands; zero-pad the head dim to HP lanes; fuse K|V weights.
    x_bf = x.astype(jnp.bfloat16)

    def pad(w):
        return jnp.pad(w, ((0, 0), (0, HP - H))).astype(jnp.bfloat16)

    wq_p = pad(wq)                                        # (C, HP)
    wkv_p = jnp.concatenate([pad(wk), pad(wv)], axis=1)   # (C, 2*HP)

    kernel = functools.partial(head_kernel, scale=scale, hp=HP)

    out_padded = pl.pallas_call(
        kernel,
        out_shape=jax.ShapeDtypeStruct((B, T, HP), x.dtype),
        grid_spec=pltpu.PrefetchScalarGridSpec(
            num_scalar_prefetch=0,
            grid=(B, nq, nk),
            in_specs=[
                pl.BlockSpec((1, tq, C), lambda b, qi, kvi: (b, qi, 0)),   # x (Q rows)
                pl.BlockSpec((1, tk, C), lambda b, qi, kvi: (b, kvi, 0)),  # x (K/V rows)
                pl.BlockSpec((C, HP), lambda b, qi, kvi: (0, 0)),          # Wq
                pl.BlockSpec((C, 2 * HP), lambda b, qi, kvi: (0, 0)),      # Wk|Wv
            ],
            out_specs=pl.BlockSpec((1, tq, HP), lambda b, qi, kvi: (b, qi, 0)),
            scratch_shapes=[
                pltpu.VMEM((tq, HP), jnp.bfloat16),   # scaled q tile
                pltpu.VMEM((tq, 1), jnp.float32),     # running max
                pltpu.VMEM((tq, 1), jnp.float32),     # running denominator
                pltpu.VMEM((tq, HP), jnp.float32),    # running accumulator
            ],
        ),
        compiler_params=pltpu.CompilerParams(
            dimension_semantics=("parallel", "parallel", "arbitrary"),
        ),
    )(x_bf, x_bf, wq_p, wkv_p)

    return out_padded[:, :, :H]


def reference_forward(x, wk, wq, wv):
    """Pure-JAX f32 reference mirroring the PyTorch module (eval mode)."""
    B, T, C = x.shape
    k = x @ wk
    q = x @ wq
    v = x @ wv
    wei = jnp.einsum("btd,bsd->bts", q, k) * (C ** -0.5)
    mask = jnp.tril(jnp.ones((T, T), dtype=bool))
    wei = jnp.where(mask, wei, -jnp.inf)
    wei = jax.nn.softmax(wei, axis=-1)
    return wei @ v


if __name__ == "__main__":
    # Shapes consistent with the module: B=2, T=block_size=8, C=n_embeds=32,
    # head_size=16.  Dropout = 0 (eval mode).
    B, T, C, H = 2, 8, 32, 16

    key = jax.random.PRNGKey(0)
    kx, kk, kq, kv, kx2 = jax.random.split(key, 5)

    x = jax.random.normal(kx, (B, T, C), dtype=jnp.float32)

    # nn.Linear(C, H, bias=False) weight is (H, C), init U(-1/sqrt(C), 1/sqrt(C)).
    # Stored transposed (C, H) so the kernel computes x @ W directly.
    bound = 1.0 / math.sqrt(C)
    wk = jax.random.uniform(kk, (C, H), minval=-bound, maxval=bound, dtype=jnp.float32)
    wq = jax.random.uniform(kq, (C, H), minval=-bound, maxval=bound, dtype=jnp.float32)
    wv = jax.random.uniform(kv, (C, H), minval=-bound, maxval=bound, dtype=jnp.float32)

    # Main (toy-shape) check: single tile per batch element.
    out = jax.block_until_ready(head_forward(x, wk, wq, wv))
    ref = reference_forward(x, wk, wq, wv)
    assert out.shape == (B, T, H)
    assert jnp.allclose(out, ref, atol=3e-2, rtol=3e-2), "mismatch vs reference (T=8)"

    # Multi-tile check: T=256 -> grid (B, 2, 2), exercises the online-softmax
    # accumulation, causal tile skipping and the resident output block.
    T2 = 256
    x2 = jax.random.normal(kx2, (B, T2, C), dtype=jnp.float32)
    out2 = jax.block_until_ready(head_forward(x2, wk, wq, wv))
    ref2 = reference_forward(x2, wk, wq, wv)
    assert out2.shape == (B, T2, H)
    assert jnp.allclose(out2, ref2, atol=3e-2, rtol=3e-2), "mismatch vs reference (T=256)"

    print("KERNEL_OK")
</pallas_src>

<mosaic_0001>
module attributes {stable_mosaic.version = 11 : i64} {
  func.func @head_kernel(%arg0: i32, %arg1: i32, %arg2: i32, %arg3: memref<1x8x32xbf16, #tpu.memory_space<vmem>>, %arg4: memref<1x8x32xbf16, #tpu.memory_space<vmem>>, %arg5: memref<32x128xbf16, #tpu.memory_space<vmem>>, %arg6: memref<32x256xbf16, #tpu.memory_space<vmem>>, %arg7: memref<1x8x128xf32, #tpu.memory_space<vmem>>, %arg8: memref<8x128xbf16, #tpu.memory_space<vmem>>, %arg9: memref<8x1xf32, #tpu.memory_space<vmem>>, %arg10: memref<8x1xf32, #tpu.memory_space<vmem>>, %arg11: memref<8x128xf32, #tpu.memory_space<vmem>>) attributes {dimension_semantics = [#tpu.dimension_semantics<parallel>, #tpu.dimension_semantics<parallel>, #tpu.dimension_semantics<arbitrary>], iteration_bounds = array<i64: 2, 1, 1>, scalar_prefetch = 0 : i64, scratch_operands = 4 : i64, tpu.core_type = #tpu.core_type<tc>, window_params = [{transform_indices = @transform_0, window_bounds = array<i64: 1, 8, 32>}, {transform_indices = @transform_1, window_bounds = array<i64: 1, 8, 32>}, {pipeline_mode = #tpu.pipeline_mode<synchronous>, transform_indices = @transform_2, window_bounds = array<i64: 32, 128>}, {pipeline_mode = #tpu.pipeline_mode<synchronous>, transform_indices = @transform_3, window_bounds = array<i64: 32, 256>}, {transform_indices = @transform_4, window_bounds = array<i64: 1, 8, 128>}]} {
    %c0_i32 = arith.constant 0 : i32
    %0 = arith.cmpi eq, %arg2, %c0_i32 : i32
    %1 = arith.extui %0 : i1 to i32
    %c0_i32_0 = arith.constant 0 : i32
    %2 = arith.cmpi ne, %1, %c0_i32_0 : i32
    scf.if %2 {
      %c0 = arith.constant 0 : index
      %c0_3 = arith.constant 0 : index
      %c0_4 = arith.constant 0 : index
      %9 = vector.load %arg3[%c0, %c0_3, %c0_4] : memref<1x8x32xbf16, #tpu.memory_space<vmem>>, vector<1x8x32xbf16>
      %10 = vector.shape_cast %9 : vector<1x8x32xbf16> to vector<8x32xbf16>
      %c0_5 = arith.constant 0 : index
      %c0_6 = arith.constant 0 : index
      %11 = vector.load %arg5[%c0_5, %c0_6] : memref<32x128xbf16, #tpu.memory_space<vmem>>, vector<32x128xbf16>
      %cst = arith.constant dense<0.000000e+00> : vector<8x128xf32>
      %12 = tpu.matmul %10, %11, %cst {dimension_numbers = #tpu.dot_dimension_numbers<[1], [0], [0], [1], [0, 0, 1, 1], [], []>} : vector<8x32xbf16>, vector<32x128xbf16>, vector<8x128xf32> -> vector<8x128xf32>
      %cst_7 = arith.constant 0.176776692 : f32
      %13 = vector.broadcast %cst_7 : f32 to vector<8x128xf32>
      %14 = arith.mulf %12, %13 : vector<8x128xf32>
      %15 = arith.truncf %14 : vector<8x128xf32> to vector<8x128xbf16>
      %c0_8 = arith.constant 0 : index
      %c0_9 = arith.constant 0 : index
      %16 = vector.load %arg8[%c0_8, %c0_9] : memref<8x128xbf16, #tpu.memory_space<vmem>>, vector<8x128xbf16>
      tpu.vector_store %arg8[%c0_8, %c0_9], %15 {strides = array<i32>} : memref<8x128xbf16, #tpu.memory_space<vmem>>, vector<8x128xbf16>,
      %cst_10 = arith.constant -1.000000e+30 : f32
      %17 = vector.broadcast %cst_10 : f32 to vector<8x1xf32>
      %c0_11 = arith.constant 0 : index
      %c0_12 = arith.constant 0 : index
      %18 = vector.load %arg9[%c0_11, %c0_12] : memref<8x1xf32, #tpu.memory_space<vmem>>, vector<8x1xf32>
      tpu.vector_store %arg9[%c0_11, %c0_12], %17 {strides = array<i32>} : memref<8x1xf32, #tpu.memory_space<vmem>>, vector<8x1xf32>,
      %cst_13 = arith.constant 0.000000e+00 : f32
      %19 = vector.broadcast %cst_13 : f32 to vector<8x1xf32>
      %c0_14 = arith.constant 0 : index
      %c0_15 = arith.constant 0 : index
      %20 = vector.load %arg10[%c0_14, %c0_15] : memref<8x1xf32, #tpu.memory_space<vmem>>, vector<8x1xf32>
      tpu.vector_store %arg10[%c0_14, %c0_15], %19 {strides = array<i32>} : memref<8x1xf32, #tpu.memory_space<vmem>>, vector<8x1xf32>,
      %cst_16 = arith.constant 0.000000e+00 : f32
      %21 = vector.broadcast %cst_16 : f32 to vector<8x128xf32>
      %c0_17 = arith.constant 0 : index
      %c0_18 = arith.constant 0 : index
      %22 = vector.load %arg11[%c0_17, %c0_18] : memref<8x128xf32, #tpu.memory_space<vmem>>, vector<8x128xf32>
      tpu.vector_store %arg11[%c0_17, %c0_18], %21 {strides = array<i32>} : memref<8x128xf32, #tpu.memory_space<vmem>>, vector<8x128xf32>,
    } else {
    }
    %3 = arith.cmpi sle, %arg2, %arg1 : i32
    %4 = arith.extui %3 : i1 to i32
    %c0_i32_1 = arith.constant 0 : i32
    %5 = arith.cmpi ne, %4, %c0_i32_1 : i32
    scf.if %5 {
      %c0 = arith.constant 0 : index
      %c0_3 = arith.constant 0 : index
      %c0_4 = arith.constant 0 : index
      %9 = vector.load %arg4[%c0, %c0_3, %c0_4] : memref<1x8x32xbf16, #tpu.memory_space<vmem>>, vector<1x8x32xbf16>
      %10 = vector.shape_cast %9 : vector<1x8x32xbf16> to vector<8x32xbf16>
      %c0_5 = arith.constant 0 : index
      %c0_6 = arith.constant 0 : index
      %11 = vector.load %arg6[%c0_5, %c0_6] : memref<32x256xbf16, #tpu.memory_space<vmem>>, vector<32x256xbf16>
      %cst = arith.constant dense<0.000000e+00> : vector<8x256xf32>
      %12 = tpu.matmul %10, %11, %cst {dimension_numbers = #tpu.dot_dimension_numbers<[1], [0], [0], [1], [0, 0, 1, 1], [], []>} : vector<8x32xbf16>, vector<32x256xbf16>, vector<8x256xf32> -> vector<8x256xf32>
      %13 = vector.extract_strided_slice %12 {offsets = [0, 0], sizes = [8, 128], strides = [1, 1]} : vector<8x256xf32> to vector<8x128xf32>
      %14 = arith.truncf %13 : vector<8x128xf32> to vector<8x128xbf16>
      %15 = vector.extract_strided_slice %12 {offsets = [0, 128], sizes = [8, 128], strides = [1, 1]} : vector<8x256xf32> to vector<8x128xf32>
      %16 = arith.truncf %15 : vector<8x128xf32> to vector<8x128xbf16>
      %c0_7 = arith.constant 0 : index
      %c0_8 = arith.constant 0 : index
      %17 = vector.load %arg8[%c0_7, %c0_8] : memref<8x128xbf16, #tpu.memory_space<vmem>>, vector<8x128xbf16>
      %cst_9 = arith.constant dense<0.000000e+00> : vector<8x8xf32>
      %18 = tpu.matmul %17, %14, %cst_9 {dimension_numbers = #tpu.dot_dimension_numbers<[1], [1], [0], [0], [0, 0, 1, 0], [], []>} : vector<8x128xbf16>, vector<8x128xbf16>, vector<8x8xf32> -> vector<8x8xf32>
      %19 = tpu.iota {dimensions = array<i32: 0>} : vector<8x8xi32>
      %20 = tpu.iota {dimensions = array<i32: 1>} : vector<8x8xi32>
      %21 = arith.cmpi sle, %20, %19 : vector<8x8xi32>
      %22 = arith.cmpi slt, %arg2, %arg1 : i32
      %23 = vector.broadcast %22 : i1 to vector<8x8xi1>
      %24 = arith.ori %21, %23 : vector<8x8xi1>
      %cst_10 = arith.constant -1.000000e+30 : f32
      %25 = vector.broadcast %cst_10 : f32 to vector<8x8xf32>
      %26 = arith.select %24, %18, %25 : vector<8x8xi1>, vector<8x8xf32>
      %c0_11 = arith.constant 0 : index
      %c0_12 = arith.constant 0 : index
      %27 = vector.load %arg9[%c0_11, %c0_12] : memref<8x1xf32, #tpu.memory_space<vmem>>, vector<8x1xf32>
      %cst_13 = arith.constant dense<0xFF800000> : vector<8xf32>
      %28 = vector.multi_reduction <maximumf>, %26, %cst_13 [1] : vector<8x8xf32> to vector<8xf32>
      %29 = vector.shape_cast %28 : vector<8xf32> to vector<8x1xf32>
      %30 = arith.maximumf %27, %29 : vector<8x1xf32>
      %31 = arith.subf %27, %30 : vector<8x1xf32>
      %32 = math.exp %31 : vector<8x1xf32>
      %33 = vector.broadcast %30 : vector<8x1xf32> to vector<8x8xf32>
      %34 = arith.subf %26, %33 : vector<8x8xf32>
      %35 = math.exp %34 : vector<8x8xf32>
      %c0_14 = arith.constant 0 : index
      %c0_15 = arith.constant 0 : index
      %36 = vector.load %arg10[%c0_14, %c0_15] : memref<8x1xf32, #tpu.memory_space<vmem>>, vector<8x1xf32>
      %37 = arith.mulf %32, %36 : vector<8x1xf32>
      %cst_16 = arith.constant dense<0.000000e+00> : vector<8xf32>
      %38 = vector.multi_reduction <add>, %35, %cst_16 [1] : vector<8x8xf32> to vector<8xf32>
      %39 = vector.shape_cast %38 : vector<8xf32> to vector<8x1xf32>
      %40 = arith.addf %37, %39 : vector<8x1xf32>
      %c0_17 = arith.constant 0 : index
      %c0_18 = arith.constant 0 : index
      %41 = vector.load %arg10[%c0_17, %c0_18] : memref<8x1xf32, #tpu.memory_space<vmem>>, vector<8x1xf32>
      tpu.vector_store %arg10[%c0_17, %c0_18], %40 {strides = array<i32>} : memref<8x1xf32, #tpu.memory_space<vmem>>, vector<8x1xf32>,
      %c0_19 = arith.constant 0 : index
      %c0_20 = arith.constant 0 : index
      %42 = vector.load %arg11[%c0_19, %c0_20] : memref<8x128xf32, #tpu.memory_space<vmem>>, vector<8x128xf32>
      %43 = vector.broadcast %32 : vector<8x1xf32> to vector<8x128xf32>
      %44 = arith.mulf %43, %42 : vector<8x128xf32>
      %45 = arith.truncf %35 : vector<8x8xf32> to vector<8x8xbf16>
      %cst_21 = arith.constant dense<0.000000e+00> : vector<8x128xf32>
      %46 = tpu.matmul %45, %16, %cst_21 {dimension_numbers = #tpu.dot_dimension_numbers<[1], [0], [0], [1], [0, 0, 1, 1], [], []>} : vector<8x8xbf16>, vector<8x128xbf16>, vector<8x128xf32> -> vector<8x128xf32>
      %47 = arith.addf %44, %46 : vector<8x128xf32>
      %c0_22 = arith.constant 0 : index
      %c0_23 = arith.constant 0 : index
      %48 = vector.load %arg11[%c0_22, %c0_23] : memref<8x128xf32, #tpu.memory_space<vmem>>, vector<8x128xf32>
      tpu.vector_store %arg11[%c0_22, %c0_23], %47 {strides = array<i32>} : memref<8x128xf32, #tpu.memory_space<vmem>>, vector<8x128xf32>,
      %c0_24 = arith.constant 0 : index
      %c0_25 = arith.constant 0 : index
      %49 = vector.load %arg9[%c0_24, %c0_25] : memref<8x1xf32, #tpu.memory_space<vmem>>, vector<8x1xf32>
      tpu.vector_store %arg9[%c0_24, %c0_25], %30 {strides = array<i32>} : memref<8x1xf32, #tpu.memory_space<vmem>>, vector<8x1xf32>,
    } else {
    }
    %6 = arith.cmpi eq, %arg2, %arg1 : i32
    %7 = arith.extui %6 : i1 to i32
    %c0_i32_2 = arith.constant 0 : i32
    %8 = arith.cmpi ne, %7, %c0_i32_2 : i32
    scf.if %8 {
      %c0 = arith.constant 0 : index
      %c0_3 = arith.constant 0 : index
      %9 = vector.load %arg10[%c0, %c0_3] : memref<8x1xf32, #tpu.memory_space<vmem>>, vector<8x1xf32>
      %10 = tpu.reciprocal %9 {approx = true} : vector<8x1xf32> -> vector<8x1xf32>
      %c0_4 = arith.constant 0 : index
      %c0_5 = arith.constant 0 : index
      %11 = vector.load %arg11[%c0_4, %c0_5] : memref<8x128xf32, #tpu.memory_space<vmem>>, vector<8x128xf32>
      %12 = vector.broadcast %10 : vector<8x1xf32> to vector<8x128xf32>
      %13 = arith.mulf %11, %12 : vector<8x128xf32>
      %c0_6 = arith.constant 0 : index
      %c0_7 = arith.constant 0 : index
      %c0_8 = arith.constant 0 : index
      %14 = vector.load %arg7[%c0_6, %c0_7, %c0_8] : memref<1x8x128xf32, #tpu.memory_space<vmem>>, vector<1x8x128xf32>
      %15 = vector.shape_cast %14 : vector<1x8x128xf32> to vector<8x128xf32>
      %16 = vector.shape_cast %13 : vector<8x128xf32> to vector<1x8x128xf32>
      tpu.vector_store %arg7[%c0_6, %c0_7, %c0_8], %16 {strides = array<i32>} : memref<1x8x128xf32, #tpu.memory_space<vmem>>, vector<1x8x128xf32>,
    } else {
    }
    return
  }
  func.func @transform_0(%arg0: i32, %arg1: i32, %arg2: i32) -> (i32, i32, i32) {
    %c0_i32 = arith.constant 0 : i32
    %c0_i32_0 = arith.constant 0 : i32
    return %arg0, %arg1, %c0_i32 : i32, i32, i32
  }
  func.func @transform_1(%arg0: i32, %arg1: i32, %arg2: i32) -> (i32, i32, i32) {
    %c0_i32 = arith.constant 0 : i32
    %c0_i32_0 = arith.constant 0 : i32
    return %arg0, %arg2, %c0_i32 : i32, i32, i32
  }
  func.func @transform_2(%arg0: i32, %arg1: i32, %arg2: i32) -> (i32, i32) {
    %c0_i32 = arith.constant 0 : i32
    %c0_i32_0 = arith.constant 0 : i32
    %c0_i32_1 = arith.constant 0 : i32
    return %c0_i32, %c0_i32_0 : i32, i32
  }
  func.func @transform_3(%arg0: i32, %arg1: i32, %arg2: i32) -> (i32, i32) {
    %c0_i32 = arith.constant 0 : i32
    %c0_i32_0 = arith.constant 0 : i32
    %c0_i32_1 = arith.constant 0 : i32
    return %c0_i32, %c0_i32_0 : i32, i32
  }
  func.func @transform_4(%arg0: i32, %arg1: i32, %arg2: i32) -> (i32, i32, i32) {
    %c0_i32 = arith.constant 0 : i32
    %c0_i32_0 = arith.constant 0 : i32
    return %arg0, %arg1, %c0_i32 : i32, i32, i32
  }
}

</mosaic_0001>

<bundles_post_ra>
// kernel: tpu_custom_call.1
= control target key start
LH: loop header
LB: loop body
LE: loop exit
PB: predicated region body
PF: predicated region fallthrough
CT: control target
= control target key end

     0   :  { %s1464_s0 = inlined_call_operand.hbm [shape: bf16[2,8,32], index: 0, kind: input, shape index: {}]   ;;  %s1465_s1 = inlined_call_operand.hbm [shape: bf16[2,8,32], index: 1, kind: input, shape index: {}]   ;;  %s1466_s2 = inlined_call_operand.hbm [shape: bf16[32,128], index: 2, kind: input, shape index: {}]   ;;  %s1467_s3 = inlined_call_operand.hbm [shape: bf16[32,256], index: 3, kind: input, shape index: {}]   ;;  %s1468_s4 = inlined_call_operand.hbm [shape: f32[2,8,128], index: 4, kind: output, shape index: {}]  }
   0x1   :  { %1474 = sst [smem:[#allocation21_spill]] %s1466_s2 }
   0x2   :  { %1475 = sst [smem:[#allocation22_spill]] %s1467_s3 }
   0x3   :  { %9 = vsyncpa [#allocation7], 0 }
   0x4   :  { %11 = vsyncpa [#allocation7 + $0x1], 0 }
   0x5   :  { %12 = vsyncpa [#allocation10], 0 }
   0x6   :  { %14 = vsyncpa [#allocation10 + $0x1], 0 }
   0x7   :  { %15 = vsyncpa [#allocation13], 0 }
   0x8   :  { %16 = vsyncpa [#allocation8], 0 }
   0x9   :  { %18 = vsyncpa [#allocation8 + $0x1], 0  ;;  %s1163_s15 = smov 0   ;;  %s1165_s16 = smov 0  }
   0xa   :  { %s1167_s17 = smov 0   ;;  %s1169_s18 = smov 0  }
   0xb   :  { %s1171_s19 = smov 0   ;;  %s1173_s20 = smov 0  }
   0xc LB: > { %s1194_s21 = sadd.s32 4294967295, %s1123_s20   ;;  %s746_s22 = sadd.s32 4294967294, %s1123_s20   ;;  %s1123_s20 = sphi %s1173_s20, %s24_s20   ;;  %s1119_s19 = sphi %s1171_s19, %s1500_s19   ;;  %s1115_s18 = sphi %s1169_s18, %s1499_s18   ;;  %s1111_s17 = sphi %s1167_s17, %s1498_s17   ;;  %s1107_s16 = sphi %s1165_s16, %s1497_s16   ;;  %s1103_s15 = sphi %s1163_s15, %s1496_s15  }
   0xd   : > { %p65_p0 = scmp.ne.s32.totalorder %s1107_s16, %s1103_s15  ;;  %p1469_p1 = scmp.eq.s32.totalorder %s1194_s21, 0 }
   0xe   : > { %p167_p3 = scmp.eq.s32.totalorder %s746_s22, 1  ;;  %p747_p5 = scmp.ge.s32.totalorder %s1123_s20, 1 }
   0xf   : > { %p1203_p4 = por %p1469_p1, %p65_p0  ;;  %p174_p7 = scmp.lt.s32.totalorder %s1123_s20, 3 }
  0x10   : > { %p1208_p6 = por %p167_p3, %p65_p0  ;;  %s1125_s26 = smov [#allocation11]  }
  0x11   : > { %s1476_s23 = scalar_select %p1203_p4, 1, 0 }
  0x12   : > { %s1477_s24 = scalar_select %p1208_p6, 1, 0 }
  0x13   : > { %p1213_p8 = pnand %p747_p5, %p174_p7  ;;  %s186_s27 = sshll.u32 %s1125_s26, 4  ;;  %s1217_s27 = int_to_ptr.vmem [resolvable:$true] %s186_s27 }
  0x14   : > { %s1126_s29 = smov [#allocation12]   ;;  %s1480_s2 = sld [smem:[#allocation21_spill]] }
  0x15   : > { %s1478_s25 = scalar_select %p1213_p8, 1, 0 }
  0x16   : > { %p815_p9 = pneg %p1213_p8  ;;  %s199_s30 = sshll.u32 %s1126_s29, 4  ;;  %s1228_s30 = int_to_ptr.vmem [resolvable:$true] %s199_s30 }
  0x18   : > { %p1224_p11 = pnand %p815_p9, %p1469_p1 }
  0x1a   : > { %s913_s7 = scalar_lea.hbm %s1480_s2, 256  ;;  %p915_p13 = pneg %p1224_p11 }
  0x1b   : > { %p914_p12 = scmp.ne.s32.totalorder %s1480_s2, %s913_s7  ;;  %p920_p5 = scmp.lt.u32.totalorder %s913_s7, %s1480_s2 }
  0x1d   : > { %p916_p0 = pnand %p915_p13, %p914_p12 }
  0x1f   : > { %p917_p3 = pneg %p916_p0 }
  0x21   : > { %p922_p7 = pnand %p920_p5, %p917_p3 }
  0x23   : > { %925 = shalt.err (!%p922_p7)
}
  0x24   : > { %s926_s12 = scalar_lea.vmem %s1217_s27, 256  ;;  %p934_p2 = scmp.lt.s32.totalorder %s1217_s27, %s1217_s27 }
  0x25   : > { %p927_p9 = scmp.ne.s32.totalorder %s1217_s27, %s926_s12  ;;  %p935_p12 = scmp.lt.s32.totalorder %s926_s12, %s926_s12 }
  0x27   : > { %p929_p10 = pnand %p927_p9, %p915_p13  ;;  %p936_p0 = por %p935_p12, %p934_p2 }
  0x29   : > { %p930_p1 = pneg %p929_p10 }
  0x2b   : > { %p937_p6 = pnand %p936_p0, %p930_p1 }
  0x2d   : > { %940 = shalt.err (!%p937_p6)
}
  0x2e   : > { %s1127_s13 = smov 64   ;;  %s1128_s14 = smov 4  }
  0x2f   : > { %818 = dma.hbm_to_vmem [thread:$0]  (!%p1224_p11), %s1480_s2, 256, %s1217_s27, [#allocation10], %s1127_s13, %s1127_s13, %s1128_s14  }
  0x30   : > { %s1481_s3 = sld [smem:[#allocation22_spill]] }
  0x36   : > { %s941_s6 = scalar_lea.hbm %s1481_s3, 512 }
  0x37   : > { %p942_p2 = scmp.ne.s32.totalorder %s1481_s3, %s941_s6  ;;  %p948_p10 = scmp.lt.u32.totalorder %s941_s6, %s1481_s3 }
  0x39   : > { %p944_p1 = pnand %p942_p2, %p915_p13 }
  0x3b   : > { %p945_p6 = pneg %p944_p1 }
  0x3d   : > { %p950_p3 = pnand %p948_p10, %p945_p6 }
  0x3f   : > { %953 = shalt.err (!%p950_p3)
}
  0x40   : > { %s954_s27 = scalar_lea.vmem %s1228_s30, 512  ;;  %p962_p12 = scmp.lt.s32.totalorder %s1228_s30, %s1228_s30 }
  0x41   : > { %p955_p5 = scmp.ne.s32.totalorder %s1228_s30, %s954_s27  ;;  %p963_p0 = scmp.lt.s32.totalorder %s954_s27, %s954_s27 }
  0x43   : > { %p957_p7 = pnand %p955_p5, %p915_p13  ;;  %p964_p2 = por %p963_p0, %p962_p12 }
  0x45   : > { %p958_p9 = pneg %p957_p7 }
  0x47   : > { %p965_p1 = pnand %p964_p2, %p958_p9 }
  0x49   : > { %968 = shalt.err (!%p965_p1)
}
  0x4a   : > { %s1129_s11 = smov 128   ;;  %s1130_s12 = smov 8  }
  0x4b   : > { %821 = dma.hbm_to_vmem [thread:$0]  (!%p1224_p11), %s1481_s3, 512, %s1228_s30, [#allocation13], %s1129_s11, %s1129_s11, %s1130_s12  }
  0x4c   : > { %s43_s22 = sadd.s32 1, %s1119_s19  ;;  %s52_s26 = sadd.s32 1, %s1111_s17 }
  0x4d   : > { %p45_p13 = scmp.ge.s32.totalorder %s43_s22, 2  ;;  %p59_p6 = scmp.ne.s32.totalorder %s1111_s17, %s1107_s16 }
  0x4e   : > { %p60_p10 = scmp.eq.s32.totalorder %s1123_s20, 0  ;;  %p835_p3 = scmp.lt.s32.totalorder %s1123_s20, 2 }
  0x4f   : > { %s1502_s22 = smov (%p45_p13, %s43_s22), 0  ;;  %p1483_p7 = scmp.eq.s32.totalorder %s1194_s21, 1 }
  0x50   : > { %1482 = sst [smem:[#allocation20_spill]] %s1502_s22  ;;  %p61_p5 = por %p60_p10, %p59_p6 }
  0x51   : > { %p1292_p9 = por %p1483_p7, %p59_p6  ;;  %s47_s28 = ssub.s32 %s1119_s19, %s1502_s22 }
  0x52   : > { %s213_s5 = sand.u32 1, %s1111_s17   ;;  %p50_p12 = scmp.eq.s32.totalorder %s47_s28, 0 }
  0x53   : > { %s1484_s29 = scalar_select %p1292_p9, 1, 0 }
  0x54   : > { %s1299_s30 = sshll.u32 %s213_s5, 2  ;;  %s752_s6 = sshll.u32 %s1119_s19, 6 }
  0x55   : > { %s1303_s7 = scalar_select %p50_p12, %s1111_s17, %s52_s26  }
  0x56   : > { %s1308_s10 = scalar_lea.hbm %s1464_s0, %s752_s6  ;;  %s217_s27 = scalar_lea.vmem [#allocation6], %s1299_s30 }
  0x57   : > { %s225_s11 = sshll.u32 %s217_s27, 4  ;;  %p1313_p11 = pnand %p835_p3, %p61_p5  ;;  %s1317_s11 = int_to_ptr.vmem [resolvable:$true] %s225_s11 }
  0x58   : > { %s1322_s26 = scalar_lea.hbm %s1465_s1, %s752_s6  ;;  %s214_s28 = scalar_lea.sflag [#allocation7], %s213_s5 }
  0x59   : > { %s969_s8 = scalar_lea.hbm %s1308_s10, 64  ;;  %p971_p2 = pneg %p1313_p11 }
  0x5a   : > { %p970_p0 = scmp.ne.s32.totalorder %s1308_s10, %s969_s8  ;;  %s974_s2 = scalar_lea.hbm %s1464_s0, 128 }
  0x5b   : > { %p975_p6 = scmp.lt.u32.totalorder %s1308_s10, %s1464_s0  ;;  %p976_p10 = scmp.lt.u32.totalorder %s974_s2, %s969_s8 }
  0x5c   : > { %p972_p1 = pnand %p971_p2, %p970_p0  ;;  %p978_p5 = scmp.lt.u32.totalorder %s969_s8, %s1308_s10 }
  0x5d   : > { %p977_p3 = por %p976_p10, %p975_p6 }
  0x5e   : > { %p973_p13 = pneg %p972_p1 }
  0x5f   : > { %p979_p7 = por %p978_p5, %p977_p3 }
  0x61   : > { %p980_p12 = pnand %p979_p7, %p973_p13 }
  0x63   : > { %983 = shalt.err (!%p980_p12)
}
  0x64   : > { %s984_s5 = scalar_lea.vmem %s1317_s11, 64  ;;  %s1131_s6 = smov [#allocation6]  }
  0x65   : > { %p985_p0 = scmp.ne.s32.totalorder %s1317_s11, %s984_s5  ;;  %s989_s13 = sshll.u32 %s1131_s6, 4  ;;  %s990_s13 = int_to_ptr.vmem [resolvable:$false] %s989_s13 }
  0x66   : > { %s991_s3 = scalar_lea.vmem %s990_s13, 128  ;;  %p992_p4 = scmp.lt.s32.totalorder %s1317_s11, %s990_s13 }
  0x67   : > { %p987_p1 = pnand %p985_p0, %p971_p2  ;;  %p993_p6 = scmp.lt.s32.totalorder %s991_s3, %s984_s5 }
  0x69   : > { %p988_p9 = pneg %p987_p1  ;;  %p994_p10 = por %p993_p6, %p992_p4 }
  0x6b   : > { %p995_p3 = pnand %p994_p10, %p988_p9 }
  0x6d   : > { %998 = shalt.err (!%p995_p3)
}
  0x6e   : > { %825 = dma.hbm_to_vmem [thread:$0]  (!%p1313_p11), %s1308_s10, 64, %s1317_s11, %s214_s28  }
  0x6f   : > { %s232_s2 = sand.u32 1, %s1123_s20   ;;  %s236_s22 = scalar_lea.vmem [#allocation9], %s1299_s30 }
  0x70   : > { %s244_s14 = sshll.u32 %s236_s22, 4  ;;  %s233_s8 = scalar_lea.sflag [#allocation10], %s232_s2  ;;  %s245_s14 = int_to_ptr.vmem [resolvable:$true] %s244_s14 }
  0x71   : > { %s999_s9 = scalar_lea.hbm %s1322_s26, 64  ;;  %s1004_s6 = scalar_lea.hbm %s1465_s1, 128 }
  0x72   : > { %p1000_p4 = scmp.ne.s32.totalorder %s1322_s26, %s999_s9  ;;  %p1005_p5 = scmp.lt.u32.totalorder %s1322_s26, %s1465_s1 }
  0x73   : > { %p1006_p7 = scmp.lt.u32.totalorder %s1004_s6, %s999_s9  ;;  %p1008_p0 = scmp.lt.u32.totalorder %s999_s9, %s1322_s26 }
  0x74   : > { %p1002_p9 = pnand %p1000_p4, %p971_p2 }
  0x75   : > { %p1007_p12 = por %p1006_p7, %p1005_p5 }
  0x76   : > { %p1003_p13 = pneg %p1002_p9 }
  0x77   : > { %p1009_p1 = por %p1008_p0, %p1007_p12 }
  0x79   : > { %p1010_p6 = pnand %p1009_p1, %p1003_p13 }
  0x7b   : > { %1013 = shalt.err (!%p1010_p6)
}
  0x7c   : > { %s1014_s30 = scalar_lea.vmem %s245_s14, 64  ;;  %s1132_s10 = smov [#allocation9]  }
  0x7d   : > { %p1015_p10 = scmp.ne.s32.totalorder %s245_s14, %s1014_s30  ;;  %s1019_s11 = sshll.u32 %s1132_s10, 4  ;;  %s1020_s11 = int_to_ptr.vmem [resolvable:$false] %s1019_s11 }
  0x7e   : > { %s1021_s28 = scalar_lea.vmem %s1020_s11, 128  ;;  %p1022_p9 = scmp.lt.s32.totalorder %s245_s14, %s1020_s11 }
  0x7f   : > { %p1017_p3 = pnand %p1015_p10, %p971_p2  ;;  %p1023_p8 = scmp.lt.s32.totalorder %s1021_s28, %s1014_s30 }
  0x81   : > { %p1018_p4 = pneg %p1017_p3  ;;  %p1024_p5 = por %p1023_p8, %p1022_p9 }
  0x83   : > { %p1025_p7 = pnand %p1024_p5, %p1018_p4 }
  0x85   : > { %1028 = shalt.err (!%p1025_p7)
}
  0x86   : > { %828 = dma.hbm_to_vmem [thread:$0]  (!%p1313_p11), %s1322_s26, 64, %s245_s14, %s233_s8  }
  0x87   : > { %p1486_p13 = scmp.ne.s32.totalorder %s1478_s25, 0 }
  0x88   : > { %s1373_s2 = sand.u32 (!%p1486_p13), 1, %s1107_s16   ;;  %p1487_p8 = scmp.ne.s32.totalorder (!%p1486_p13), %s1476_s23, 0 }
  0x89   : > { %253 = sbr.rel (%p1486_p13) target bundleno = 1198 (0x4ae), region = 36  ;;  %s756_s22 = sshll.u32 (!%p1486_p13), %s1373_s2, 2 }
  0x8a   : > { %s256_s9 = scalar_lea.sflag (!%p1486_p13), [#allocation7], %s1373_s2  ;;  %s1377_s27 = scalar_lea.vmem (!%p1486_p13), [#allocation6], %s756_s22 }
  0x90   : > { %1082 = dma.done.wait (%p1487_p8), %s256_s9, 64  }
  0x91   : > { %1084 = vsyncadd (%p1487_p8), %s256_s9, 4294967232  ;;  %s264_s12 = sand.u32 1, %s1194_s21   ;;  %s1384_s26 = scalar_lea.vmem [#allocation9], %s756_s22 }
  0x92   : > { %s265_s25 = scalar_lea.sflag [#allocation10], %s264_s12 }
  0x93   : > { %1086 = dma.done.wait (%p1487_p8), %s265_s25, 64  }
  0x94   : > { %1088 = vsyncadd (%p1487_p8), %s265_s25, 4294967232  ;;  %p1488_p11 = scmp.eq.s32.totalorder %s1194_s21, 0 }
  0x96   : > { %1090 = dma.done.wait (%p1488_p11), [#allocation10], 256   ;;  %p1489_p2 = pmov %p1488_p11 }
  0x98   : > { %1092 = vsyncadd (%p1489_p2), [#allocation10], 4294967040  ;;  %p1490_p12 = pmov %p1489_p2 }
  0x99   : > { %p1491_p0 = pmov %p1489_p2 }
  0x9a   : > { %1094 = dma.done.wait (%p1490_p12), [#allocation13], 512  }
  0x9b   : > { %1096 = vsyncadd (%p1491_p0), [#allocation13], 4294966784  ;;  %v1133_v0 = vmov 0.0   ;;  %vm1134_vm0 = vmmov 0   ;;  %v1135_v1 = vmov 0   ;;  %v899_v2 = vld [vmem:[#allocation11] sm:$0xff]   ;;  %v496_v25 = vlaneseq }
  0x9c   : > { %781 = vmatprep.subr.bf16.mxu0 %v1133_v0  ;;  %785 = vmatprep.mubr.msk.bf16.mxu0 %vm1134_vm0, %v1133_v0  ;;  %v900_v3 = vld [vmem:[#allocation12 + $0x4] ss:$8 sps:$4 sm:$0xff]   ;;  %v902_v4 = vld [vmem:[#allocation12] ss:$8 sps:$4 sm:$0xff]   ;;  %v903_v5 = vld [vmem:[#allocation11 + $0x8] sm:$0xff]   ;;  %vm328_vm1 = vcmask 261120  }
  0x9d   : > { %444 = vmatprep.mubr.bf16.mxu1 %v1135_v1  ;;  %897 = vset.pattern.permute.xlu0 %v1135_v1  ;;  %v904_v6 = vld [vmem:[#allocation12 + $0x14] ss:$8 sps:$4 sm:$0xff]   ;;  %v906_v7 = vld [vmem:[#allocation12 + $0x10] ss:$8 sps:$4 sm:$0xff]   ;;  %v311_v8 = vld [vmem:[%s1377_s27] sm:$0xf] }
  0x9e   : > { %898 = vset.pattern.permute.xlu1 %v1135_v1  ;;  %782 = vmatpush3.bf16.msra.mxu0 %v899_v2  ;;  %v383_v9 = vld [vmem:[%s1384_s26] sm:$0xf]  ;;  %vm543_vm2 = vcmask 1043456   ;;  %vm375_vm3 = vcmask 7168   ;;  %v1136_v24 = vmov -1e+30  }
  0x9f   : > { %412 = vmatprep.subr.bf16.mxu1 %v900_v3  ;;  %783 = vmatprep.subr.bf16.mxu0 %v1133_v0  ;;  %376 = vst.msk [vmem:[#allocation3] sm:$0xff] %vm375_vm3, %v1136_v24  ;;  %377 = vst.msk [vmem:[#allocation4] sm:$0xff] %vm375_vm3, %v1133_v0  ;;  %v497_v26 = vshrl.u32 %v496_v25, 7  ;;  %v499_v27 = vand.u32 127, %v496_v25  ;;  %vm508_vm5 = vcmask 64512   ;;  %s760_s21 = sshll.u32 %s1373_s2, 3 }
  0xa0   : > { %413 = vmatpush1.bf16.msra.mxu1 %v902_v4  ;;  %s771_s23 = sshll.u32 %s1115_s18, 7  ;;  %s305_s14 = scalar_lea.vmem [#allocation14], %s760_s21 }
  0xa1   : > { %414 = vmatprep.subr.bf16.mxu1 %v904_v6  ;;  %vm500_vm4 = vcmp.le.s32.totalorder %v499_v27, %v497_v26  ;;  %s619_s8 = sshll.u32 %s305_s14, 4  ;;  %s1415_s13 = scalar_lea.hbm %s1468_s4, %s771_s23  ;;  %s1417_s8 = int_to_ptr.vmem [resolvable:$true] %s619_s8 }
  0xa2   : > { %784 = vmatpush3.bf16.msra.mxu0 %v903_v5  ;;  %s605_s3 = scalar_lea.sflag [#allocation8], %s1373_s2  ;;  %s1029_s30 = scalar_lea.vmem %s1417_s8, 128 }
  0xa3   : > { %789 = vmatprep.subr.bf16.mxu0 %v1133_v0  ;;  %p1030_p1 = scmp.ne.s32.totalorder %s1417_s8, %s1029_s30  ;;  %p1492_p6 = scmp.ne.s32.totalorder %s1484_s29, 0 }
  0xa4   : > { %415 = vmatpush1.bf16.msra.mxu1 %v906_v7  ;;  %s1137_s18 = smov [#allocation14]  }
  0xa5   : > { %786 = vmatmul.mubr.msk.bf16.vlgmr.msra.gmra.mrb[0].mxu0 %vm328_vm1, %v311_v8  ;;  %795 = vmatprep.subr.bf16.mxu1 %v1133_v0  ;;  %p1031_p10 = pnand %p1030_p1, %p1492_p6  ;;  %s1033_s10 = sshll.u32 %s1137_s18, 4  ;;  %s1034_s10 = int_to_ptr.vmem [resolvable:$false] %s1033_s10 }
  0xa6   : > { %791 = vmatprep.mubr.msk.bf16.mxu0 %vm1134_vm0, %v1133_v0  ;;  %v507_v34 = vld [vmem:[#allocation3] sm:$0xff]  ;;  %v524_v46 = vld [vmem:[#allocation4] sm:$0xff]  ;;  %s1035_s11 = scalar_lea.vmem %s1034_s10, 256  ;;  %p1036_p4 = scmp.lt.s32.totalorder %s1417_s8, %s1034_s10 }
  0xa7   : > { %768 = vmatmul.mubr.msk.bf16.vlgmr.msra.gmra.mrb[0].mxu1 %vm328_vm1, %v383_v9  ;;  %p1032_p3 = pneg %p1031_p10  ;;  %p1037_p9 = scmp.lt.s32.totalorder %s1035_s11, %s1029_s30 }
  0xa8   : > { %797 = vmatprep.mubr.msk.bf16.mxu1 %vm1134_vm0, %v1133_v0 }
  0xa9   : > { %p1038_p5 = por %p1037_p9, %p1036_p4 }
  0xab   : > { %p1039_p7 = pnand %p1038_p5, %p1032_p3 }
 0x178   : > { %v366_v10 = vpop.f32.mrb[0].mxu0 }
 0x179   : > { %v372_v11 = vmul.f32 0.17677669, %v366_v10  ;;  %v787_v12 = vpop.f32.mrb[1].mxu0 }
 0x17a   : > { %v446_v13 = vpop.f32.mrb[0].mxu1  ;;  %v369_v14 = vpop.f32.mrb[2].mxu0 }
 0x17b   : > { %v373_v15 = vpack.c.bf16 %v372_v11, %v372_v11  ;;  %v453_v16 = vpack.c.bf16 %v446_v13, %v446_v13  ;;  %v448_v17 = vpop.f32.mrb[1].mxu1  ;;  %v788_v18 = vpop.f32.mrb[3].mxu0 }
 0x17c   : > { %v454_v19 = vpack.c.bf16 %v448_v17, %v448_v17  ;;  %v450_v20 = vpop.f32.mrb[2].mxu1 }
 0x17d   : > { %374 = vst [vmem:[#allocation2] sm:$0xf] %v373_v15  ;;  %v451_v21 = vpop.f32.mrb[3].mxu1  ;;  %790 = vmatpush3.bf16.xpose.msra.mxu0 %v453_v16 }
 0x17e   : > { %v545_v22 = vsel %vm543_vm2, %v454_v19, 0 }
 0x17f   : > { %796 = vmatpush3.bf16.msra.mxu1 %v545_v22 }
 0x184   : > { %v455_v23 = vld [vmem:[#allocation2] sm:$0xf] }
 0x185   : > { %792 = vmatmul.mubr.bf16.vlgmr.msra.gmra.mrb[4].mxu0 %v455_v23 }
 0x258   : > { %v490_v28 = vpop.f32.mrb[4].mxu0 }
 0x259   : > { %v506_v29 = vsel %vm500_vm4, %v490_v28, -1e+30  ;;  %v793_v30 = vpop.f32.mrb[5].mxu0 }
 0x25a   : > { %v493_v31 = vpop.f32.mrb[6].mxu0  ;;  %v509_v32 = vsel %vm508_vm5, %v506_v29, -inf }
 0x25b   : > { %510 = vmax.xlane.f32.xlu0 %v509_v32  ;;  %v794_v33 = vpop.f32.mrb[7].mxu0 }
 0x2e8   : > { %v511_v35 = vpop.xlane.xlu0 %510 }
 0x2e9   : > { %v512_v36 = vmax.f32 %v507_v34, %v511_v35 }
 0x2eb   : > { %v513_v37 = vsub.f32 %v507_v34, %v512_v36  ;;  %589 = vst.msk [vmem:[#allocation3] sm:$0xff] %vm375_vm3, %v512_v36  ;;  %518 = vperm.xlu0 %897, %v512_v36  }
 0x2ed   : > { %v514_v44 = vmul.f32 1.442695, %v513_v37 }
 0x36a   : > { %v519_v38 = vpop.permute.xlu0 %518 }
 0x36b   : > { %v521_v39 = vsub.f32 %v506_v29, %v519_v38 }
 0x36d   : > { %v522_v40 = vmul.f32 1.442695, %v521_v39 }
 0x36f   : > { %907 = vpow2.f32 %v522_v40 }
 0x370   : > { %909 = vpow2.f32 %v514_v44 }
 0x379   : > { %v908_v41 = vpop.eup %907 }
 0x37a   : > { %v526_v42 = vsel %vm508_vm5, %v908_v41, 0.0  ;;  %v539_v43 = vpack.c.bf16 %v908_v41, %v908_v41  ;;  %v910_v45 = vpop.eup %909 }
 0x37b   : > { %527 = vadd.xlane.f32.xlu1 %v526_v42  ;;  %v525_v47 = vmul.f32 %v910_v45, %v524_v46 }
 0x37c   : > { %798 = vmatmul.mubr.msk.bf16.vlgmr.msra.gmra.mrb[4].mxu1 %vm508_vm5, %v539_v43 }
 0x38c   : > { %535 = vperm.xlu1 %898, %v910_v45  }
 0x408   : > { %v528_v48 = vpop.xlane.xlu1 %527 }
 0x409   : > { %v529_v49 = vadd.f32 %v528_v48, %v525_v47 }
 0x40b   : > { %531 = vst.msk [vmem:[#allocation4] sm:$0xff] %vm375_vm3, %v529_v49 }
 0x40c   : > { %v536_v56 = vpop.permute.xlu1 %535 }
 0x40d   : > { %v538_v57 = vmul.f32 0.0, %v536_v56 }
 0x412   : > { %v594_v50 = vld [vmem:[#allocation4] sm:$0xff] }
 0x413   : > { %911 = vrcp.f32 %v594_v50 }
 0x41d   : > { %v912_v51 = vpop.eup %911 }
 0x41e   : > { %599 = vperm.xlu1 %898, %v912_v51  }
 0x44f   : > { %v581_v52 = vpop.f32.mrb[4].mxu1 }
 0x450   : > { %v799_v53 = vpop.f32.mrb[5].mxu1  ;;  %v587_v58 = vadd.f32 %v581_v52, %v538_v57 }
 0x451   : > { %v584_v54 = vpop.f32.mrb[6].mxu1 }
 0x452   : > { %v800_v55 = vpop.f32.mrb[7].mxu1 }
 0x49d   : > { %v600_v59 = vpop.permute.xlu1 %599 }
 0x49e   : > { %v602_v60 = vmul.f32 %v600_v59, %v587_v58 }
 0x4a0   : > { %603 = vst [vmem:[%s305_s14] sm:$0xff] %v602_v60 }
 0x4a1   : > { %1042 = shalt.err (!%p1039_p7)
}
 0x4a2   : > { %s1043_s28 = scalar_lea.hbm %s1415_s13, 128  ;;  %s1047_s9 = scalar_lea.hbm %s1468_s4, 256 }
 0x4a3   : > { %p1044_p13 = scmp.ne.s32.totalorder %s1415_s13, %s1043_s28  ;;  %p1048_p2 = scmp.lt.u32.totalorder %s1415_s13, %s1468_s4 }
 0x4a4   : > { %p1049_p12 = scmp.lt.u32.totalorder %s1047_s9, %s1043_s28  ;;  %p1051_p1 = scmp.lt.u32.totalorder %s1043_s28, %s1415_s13 }
 0x4a5   : > { %p1045_p8 = pnand %p1044_p13, %p1492_p6 }
 0x4a6   : > { %p1050_p0 = por %p1049_p12, %p1048_p2 }
 0x4a7   : > { %p1046_p11 = pneg %p1045_p8 }
 0x4a8   : > { %p1052_p10 = por %p1051_p1, %p1050_p0 }
 0x4aa   : > { %p1053_p3 = pnand %p1052_p10, %p1046_p11 }
 0x4ac   : > { %1056 = shalt.err (!%p1053_p3)
}
 0x4ad   : > { %813 = dma.vmem_to_hbm [thread:$0]  (%p1492_p6), %s1417_s8, 128, %s1415_s13, %s605_s3  }
 0x4ae PF: > { %s631_s25 = sand.u32 1, %s1103_s15   ;;  %p1493_p4 = scmp.ne.s32.totalorder %s1477_s24, 0 }
 0x4af   : > { %p1494_p9 = scmp.ge.s32.totalorder %s1123_s20, 2  ;;  %s632_s26 = scalar_lea.sflag [#allocation8], %s631_s25 }
 0x4b1   : > { %p830_p5 = pnand %p1494_p9, %p1493_p4 }
 0x4b3   : > { %1098 = dma.done.wait (!%p830_p5), %s632_s26, 128  }
 0x4b4   : > { %1100 = vsyncadd (!%p830_p5), %s632_s26, 4294967168  ;;  %s24_s20 = sadd.s32 1, %s1123_s20   ;;  %s1495_s29 = sld [smem:[#allocation20_spill]] }
 0x4b5   : > { %p21_p7 = scmp.ge.s32.totalorder %s24_s20, 4   ;;  %s1496_s15 = smov %s1107_s16 }
 0x4b6   : > { %s1497_s16 = smov %s1111_s17  ;;  %s1498_s17 = smov %s1303_s7 }
 0x4b7   : > { %s1499_s18 = smov %s1119_s19  ;;  %23 = sbr.rel (!%p21_p7) target bundleno = 12 (0xc), region = 114 }
 0x4ba   : > { %s1500_s19 = smov %s1495_s29 }
 0x4be   :  { %637 = vsyncpa [#allocation7], 1 }
 0x4bf   :  { %639 = vsyncpa [#allocation7 + $0x1], 1 }
 0x4c0   :  { %640 = vsyncpa [#allocation10], 1 }
 0x4c1   :  { %642 = vsyncpa [#allocation10 + $0x1], 1 }
 0x4c2   :  { %643 = vsyncpa [#allocation13], 1 }
 0x4c3   :  { %644 = vsyncpa [#allocation8], 1 }
 0x4c4   :  { %646 = vsyncpa [#allocation8 + $0x1], 1 }

</bundles_post_ra>
